<compile_context>
chip_gen: v7x
topology: tpu7x:2x2x1
jax: 0.10.0
libtpu: 0.0.40
codegen_flags: <defaults>
</compile_context>

<pallas_src>
import numpy as np
import jax
import jax.numpy as jnp
from jax import lax
from jax.experimental import pallas as pl
from jax.experimental.pallas import tpu as pltpu

EPS = 1e-5


# ----------------------------------------------------------------------------
# Pallas kernel: whole forward (conv stack + BN + ReLU + dueling heads + combine)
# ----------------------------------------------------------------------------
def dueling_dqn_kernel(x_ref,                      # (B, 90)    flattened 3x3x10 center
                       t1_ref, s1_ref, sh1_ref,    # (90, 400), (1, 400), (1, 400)
                       t2_ref, s2_ref, sh2_ref,    # (400, 288), (1, 288), (1, 288)
                       t3_ref, b3_ref,             # (288, 32), (1, 32)
                       wh1_ref, bh1_ref,           # (32, 256), (1, 256)   merged head L1
                       wh2_ref, bh2_ref,           # (256, 128), (1, 128)  merged head L2
                       q_ref):                     # (B, 128)   lane-dense output
    x = x_ref[...]                                                        # (B, 90)

    # conv1 (pad=2) + BN1 + ReLU  -> flattened 5x5x16
    f1 = jnp.maximum(
        jnp.dot(x, t1_ref[...], preferred_element_type=jnp.float32)
        * s1_ref[...] + sh1_ref[...], 0.0)                                # (B, 400)

    # conv2 + BN2 + ReLU  -> flattened 3x3x32
    f2 = jnp.maximum(
        jnp.dot(f1, t2_ref[...], preferred_element_type=jnp.float32)
        * s2_ref[...] + sh2_ref[...], 0.0)                                # (B, 288)

    # conv3 + bias + ReLU -> features (1x1x32 flattened)
    feats = jnp.maximum(
        jnp.dot(f2, t3_ref[...], preferred_element_type=jnp.float32)
        + b3_ref[...], 0.0)                                               # (B, 32)

    # merged dueling heads: hidden layer (value || advantage), then output layer
    h = jnp.maximum(
        jnp.dot(feats, wh1_ref[...], preferred_element_type=jnp.float32)
        + bh1_ref[...], 0.0)                                              # (B, 256)
    o2 = jnp.dot(h, wh2_ref[...],
                 preferred_element_type=jnp.float32) + bh2_ref[...]       # (B, 128)
    # o2 columns: [ value, adv0, adv1, adv2, 0, 0, ... ]

    B = o2.shape[0]
    lane = lax.broadcasted_iota(jnp.int32, o2.shape, 1)
    adv_mask = (lane >= 1) & (lane < 4)

    # global mean over ALL advantage elements (matches torch advantages.mean())
    adv_mean = jnp.sum(jnp.where(adv_mask, o2, 0.0)) / (B * 3.0)

    # value column extracted via a masked lane-reduce (no width-1 lane slice)
    v = jnp.sum(jnp.where(lane == 0, o2, 0.0), axis=1, keepdims=True)     # (B, 1)

    # q in lanes 1..3, zeros elsewhere -> unmasked full-width store
    q_ref[...] = jnp.where(adv_mask, v + o2 - adv_mean, 0.0)


# ----------------------------------------------------------------------------
# One-time parameter packing (host side)
# ----------------------------------------------------------------------------
def _conv_toeplitz(w, ih, iw, pad):
    """w: (3,3,cin,cout) HWIO -> dense (ih*iw*cin, oh*ow*cout) Toeplitz matrix
    implementing the padded 3x3 conv as a single matmul on (h,w,c)-flattened maps."""
    w = np.asarray(w, np.float32)
    kh, kw, cin, cout = w.shape
    oh = ih + 2 * pad - kh + 1
    ow = iw + 2 * pad - kw + 1
    T = np.zeros((ih * iw * cin, oh * ow * cout), np.float32)
    for oy in range(oh):
        for ox in range(ow):
            for a in range(kh):
                for b in range(kw):
                    iy = oy + a - pad
                    ix = ox + b - pad
                    if 0 <= iy < ih and 0 <= ix < iw:
                        r0 = (iy * iw + ix) * cin
                        c0 = (oy * ow + ox) * cout
                        T[r0:r0 + cin, c0:c0 + cout] = w[a, b]
    return T


def pack_params(P):
    """Build all matmul-ready weights once; returns a tuple of device arrays."""
    def a(x):
        return np.asarray(x, np.float32)

    # fold conv bias + eval-mode BN into per-channel scale/shift
    s1 = a(P["g1"]) / np.sqrt(a(P["v1"]) + EPS)
    t1 = a(P["be1"]) + s1 * (a(P["b1"]) - a(P["m1"]))
    s2 = a(P["g2"]) / np.sqrt(a(P["v2"]) + EPS)
    t2 = a(P["be2"]) + s2 * (a(P["b2"]) - a(P["m2"]))

    T1 = _conv_toeplitz(P["w1"], ih=3, iw=3, pad=2)      # (90, 400)
    T2 = _conv_toeplitz(P["w2"], ih=5, iw=5, pad=0)      # (400, 288)
    T3 = _conv_toeplitz(P["w3"], ih=3, iw=3, pad=0)      # (288, 32)

    s1_t = np.tile(s1, 25).reshape(1, 400)
    t1_t = np.tile(t1, 25).reshape(1, 400)
    s2_t = np.tile(s2, 9).reshape(1, 288)
    t2_t = np.tile(t2, 9).reshape(1, 288)
    b3_t = a(P["b3"]).reshape(1, 32)

    # merged dueling heads
    wh1 = np.concatenate([a(P["wv1"]), a(P["wa1"])], axis=1)            # (32, 256)
    bh1 = np.concatenate([a(P["bv1"]), a(P["ba1"])]).reshape(1, 256)
    wh2 = np.zeros((256, 128), np.float32)                              # block-diag, lane-padded
    wh2[:128, 0:1] = a(P["wv2"])
    wh2[128:, 1:4] = a(P["wa2"])
    bh2 = np.zeros((1, 128), np.float32)
    bh2[0, 0] = a(P["bv2"])[0]
    bh2[0, 1:4] = a(P["ba2"])

    packed = (T1, s1_t, t1_t, T2, s2_t, t2_t, T3, b3_t, wh1, bh1, wh2, bh2)
    return tuple(jnp.asarray(p) for p in packed)


# ----------------------------------------------------------------------------
# Jitted forward: crop + flatten + single pallas_call
# ----------------------------------------------------------------------------
@jax.jit
def dueling_dqn_forward(x, packed):
    B = x.shape[0]
    center = x[:, 3:6, 3:6, :].astype(jnp.float32)        # (B, 3, 3, 10)
    xf = center.reshape(B, 90)                            # (h, w, c) flatten

    q128 = pl.pallas_call(
        dueling_dqn_kernel,
        out_shape=jax.ShapeDtypeStruct((B, 128), jnp.float32),
        in_specs=[pl.BlockSpec(memory_space=pltpu.MemorySpace.VMEM)] * (1 + len(packed)),
        out_specs=pl.BlockSpec(memory_space=pltpu.MemorySpace.VMEM),
    )(xf, *packed)

    return jnp.squeeze(q128[:, 1:4])                      # matches q_vals.squeeze()


def dueling_dqn_pallas(x, P):
    return dueling_dqn_forward(x, pack_params(P))


# ----------------------------------------------------------------------------
# Pure-JAX reference (same semantics as the PyTorch module, eval-mode BN)
# ----------------------------------------------------------------------------
def dueling_dqn_reference(x, P):
    center = x[:, 3:6, 3:6, :]

    def conv(y, w, pad):
        return lax.conv_general_dilated(y, w, (1, 1), pad,
                                        dimension_numbers=("NHWC", "HWIO", "NHWC"))

    y = conv(center, P["w1"], [(2, 2), (2, 2)]) + P["b1"]
    y = (y - P["m1"]) / jnp.sqrt(P["v1"] + EPS) * P["g1"] + P["be1"]
    y = jnp.maximum(y, 0.0)
    y = conv(y, P["w2"], [(0, 0), (0, 0)]) + P["b2"]
    y = (y - P["m2"]) / jnp.sqrt(P["v2"] + EPS) * P["g2"] + P["be2"]
    y = jnp.maximum(y, 0.0)
    y = conv(y, P["w3"], [(0, 0), (0, 0)]) + P["b3"]
    y = jnp.maximum(y, 0.0)
    feats = y.reshape(y.shape[0], -1)                                # (B, 32)

    hv = jnp.maximum(feats @ P["wv1"] + P["bv1"], 0.0)
    v = hv @ P["wv2"] + P["bv2"]                                     # (B, 1)
    ha = jnp.maximum(feats @ P["wa1"] + P["ba1"], 0.0)
    adv = jnp.squeeze(ha @ P["wa2"] + P["ba2"])                      # (B, 3)
    q = v + (adv - adv.mean())
    return jnp.squeeze(q)


# ----------------------------------------------------------------------------
def make_params(key):
    ks = jax.random.split(key, 22)

    def nrm(k, shape, scale):
        return scale * jax.random.normal(k, shape, jnp.float32)

    P = dict(
        # conv1 (10 -> 16, k=3, pad=2) + BN1
        w1=nrm(ks[0], (3, 3, 10, 16), 0.10), b1=nrm(ks[1], (16,), 0.10),
        g1=1.0 + nrm(ks[2], (16,), 0.10), be1=nrm(ks[3], (16,), 0.10),
        m1=nrm(ks[4], (16,), 0.10), v1=1.0 + jnp.abs(nrm(ks[5], (16,), 0.10)),
        # conv2 (16 -> 32, k=3) + BN2
        w2=nrm(ks[6], (3, 3, 16, 32), 0.08), b2=nrm(ks[7], (32,), 0.10),
        g2=1.0 + nrm(ks[8], (32,), 0.10), be2=nrm(ks[9], (32,), 0.10),
        m2=nrm(ks[10], (32,), 0.10), v2=1.0 + jnp.abs(nrm(ks[11], (32,), 0.10)),
        # conv3 (32 -> 32, k=3)
        w3=nrm(ks[12], (3, 3, 32, 32), 0.08), b3=nrm(ks[13], (32,), 0.10),
        # value stream: Linear(32,128) -> ReLU -> Linear(128,1)   (weights stored as (in,out))
        wv1=nrm(ks[14], (32, 128), 0.10), bv1=nrm(ks[15], (128,), 0.10),
        wv2=nrm(ks[16], (128, 1), 0.10), bv2=nrm(ks[17], (1,), 0.10),
        # advantage stream: Linear(32,128) -> ReLU -> Linear(128,3)
        wa1=nrm(ks[18], (32, 128), 0.10), ba1=nrm(ks[19], (128,), 0.10),
        wa2=nrm(ks[20], (128, 3), 0.10), ba2=nrm(ks[21], (3,), 0.10),
    )
    return P


if __name__ == "__main__":
    key = jax.random.PRNGKey(0)
    k_params, k_x = jax.random.split(key)

    P = make_params(k_params)
    # input: NHWC, batch=2, 9x9 board, 10 channels (module crops [3:6, 3:6])
    x = jax.random.normal(k_x, (2, 9, 9, 10), jnp.float32)

    packed = pack_params(P)                      # one-time packing (hoisted out of call path)
    q_pallas = dueling_dqn_forward(x, packed)
    q_pallas = jax.block_until_ready(q_pallas)

    q_ref = jax.block_until_ready(dueling_dqn_reference(x, P))

    np.testing.assert_allclose(np.asarray(q_pallas), np.asarray(q_ref),
                               rtol=2e-2, atol=2e-2)
    print("KERNEL_OK")
</pallas_src>

<mosaic_0001>
module attributes {stable_mosaic.version = 11 : i64} {
  func.func @dueling_dqn_kernel(%arg0: memref<2x90xf32, #tpu.memory_space<vmem>>, %arg1: memref<90x400xf32, #tpu.memory_space<vmem>>, %arg2: memref<1x400xf32, #tpu.memory_space<vmem>>, %arg3: memref<1x400xf32, #tpu.memory_space<vmem>>, %arg4: memref<400x288xf32, #tpu.memory_space<vmem>>, %arg5: memref<1x288xf32, #tpu.memory_space<vmem>>, %arg6: memref<1x288xf32, #tpu.memory_space<vmem>>, %arg7: memref<288x32xf32, #tpu.memory_space<vmem>>, %arg8: memref<1x32xf32, #tpu.memory_space<vmem>>, %arg9: memref<32x256xf32, #tpu.memory_space<vmem>>, %arg10: memref<1x256xf32, #tpu.memory_space<vmem>>, %arg11: memref<256x128xf32, #tpu.memory_space<vmem>>, %arg12: memref<1x128xf32, #tpu.memory_space<vmem>>, %arg13: memref<2x128xf32, #tpu.memory_space<vmem>>) attributes {dimension_semantics = [], scalar_prefetch = 0 : i64, scratch_operands = 0 : i64, tpu.core_type = #tpu.core_type<tc>} {
    %c0 = arith.constant 0 : index
    %c0_0 = arith.constant 0 : index
    %0 = vector.load %arg0[%c0, %c0_0] : memref<2x90xf32, #tpu.memory_space<vmem>>, vector<2x90xf32>
    %c0_1 = arith.constant 0 : index
    %c0_2 = arith.constant 0 : index
    %1 = vector.load %arg1[%c0_1, %c0_2] : memref<90x400xf32, #tpu.memory_space<vmem>>, vector<90x400xf32>
    %cst = arith.constant dense<0.000000e+00> : vector<2x400xf32>
    %2 = tpu.matmul %0, %1, %cst {dimension_numbers = #tpu.dot_dimension_numbers<[1], [0], [0], [1], [0, 0, 1, 1], [], []>} : vector<2x90xf32>, vector<90x400xf32>, vector<2x400xf32> -> vector<2x400xf32>
    %c0_3 = arith.constant 0 : index
    %c0_4 = arith.constant 0 : index
    %3 = vector.load %arg2[%c0_3, %c0_4] : memref<1x400xf32, #tpu.memory_space<vmem>>, vector<1x400xf32>
    %4 = vector.broadcast %3 : vector<1x400xf32> to vector<2x400xf32>
    %5 = arith.mulf %2, %4 : vector<2x400xf32>
    %c0_5 = arith.constant 0 : index
    %c0_6 = arith.constant 0 : index
    %6 = vector.load %arg3[%c0_5, %c0_6] : memref<1x400xf32, #tpu.memory_space<vmem>>, vector<1x400xf32>
    %7 = vector.broadcast %6 : vector<1x400xf32> to vector<2x400xf32>
    %8 = arith.addf %5, %7 : vector<2x400xf32>
    %cst_7 = arith.constant 0.000000e+00 : f32
    %9 = vector.broadcast %cst_7 : f32 to vector<2x400xf32>
    %10 = arith.maximumf %8, %9 : vector<2x400xf32>
    %c0_8 = arith.constant 0 : index
    %c0_9 = arith.constant 0 : index
    %11 = vector.load %arg4[%c0_8, %c0_9] : memref<400x288xf32, #tpu.memory_space<vmem>>, vector<400x288xf32>
    %cst_10 = arith.constant dense<0.000000e+00> : vector<2x288xf32>
    %12 = tpu.matmul %10, %11, %cst_10 {dimension_numbers = #tpu.dot_dimension_numbers<[1], [0], [0], [1], [0, 0, 1, 1], [], []>} : vector<2x400xf32>, vector<400x288xf32>, vector<2x288xf32> -> vector<2x288xf32>
    %c0_11 = arith.constant 0 : index
    %c0_12 = arith.constant 0 : index
    %13 = vector.load %arg5[%c0_11, %c0_12] : memref<1x288xf32, #tpu.memory_space<vmem>>, vector<1x288xf32>
    %14 = vector.broadcast %13 : vector<1x288xf32> to vector<2x288xf32>
    %15 = arith.mulf %12, %14 : vector<2x288xf32>
    %c0_13 = arith.constant 0 : index
    %c0_14 = arith.constant 0 : index
    %16 = vector.load %arg6[%c0_13, %c0_14] : memref<1x288xf32, #tpu.memory_space<vmem>>, vector<1x288xf32>
    %17 = vector.broadcast %16 : vector<1x288xf32> to vector<2x288xf32>
    %18 = arith.addf %15, %17 : vector<2x288xf32>
    %cst_15 = arith.constant 0.000000e+00 : f32
    %19 = vector.broadcast %cst_15 : f32 to vector<2x288xf32>
    %20 = arith.maximumf %18, %19 : vector<2x288xf32>
    %c0_16 = arith.constant 0 : index
    %c0_17 = arith.constant 0 : index
    %21 = vector.load %arg7[%c0_16, %c0_17] : memref<288x32xf32, #tpu.memory_space<vmem>>, vector<288x32xf32>
    %cst_18 = arith.constant dense<0.000000e+00> : vector<2x32xf32>
    %22 = tpu.matmul %20, %21, %cst_18 {dimension_numbers = #tpu.dot_dimension_numbers<[1], [0], [0], [1], [0, 0, 1, 1], [], []>} : vector<2x288xf32>, vector<288x32xf32>, vector<2x32xf32> -> vector<2x32xf32>
    %c0_19 = arith.constant 0 : index
    %c0_20 = arith.constant 0 : index
    %23 = vector.load %arg8[%c0_19, %c0_20] : memref<1x32xf32, #tpu.memory_space<vmem>>, vector<1x32xf32>
    %24 = vector.broadcast %23 : vector<1x32xf32> to vector<2x32xf32>
    %25 = arith.addf %22, %24 : vector<2x32xf32>
    %cst_21 = arith.constant 0.000000e+00 : f32
    %26 = vector.broadcast %cst_21 : f32 to vector<2x32xf32>
    %27 = arith.maximumf %25, %26 : vector<2x32xf32>
    %c0_22 = arith.constant 0 : index
    %c0_23 = arith.constant 0 : index
    %28 = vector.load %arg9[%c0_22, %c0_23] : memref<32x256xf32, #tpu.memory_space<vmem>>, vector<32x256xf32>
    %cst_24 = arith.constant dense<0.000000e+00> : vector<2x256xf32>
    %29 = tpu.matmul %27, %28, %cst_24 {dimension_numbers = #tpu.dot_dimension_numbers<[1], [0], [0], [1], [0, 0, 1, 1], [], []>} : vector<2x32xf32>, vector<32x256xf32>, vector<2x256xf32> -> vector<2x256xf32>
    %c0_25 = arith.constant 0 : index
    %c0_26 = arith.constant 0 : index
    %30 = vector.load %arg10[%c0_25, %c0_26] : memref<1x256xf32, #tpu.memory_space<vmem>>, vector<1x256xf32>
    %31 = vector.broadcast %30 : vector<1x256xf32> to vector<2x256xf32>
    %32 = arith.addf %29, %31 : vector<2x256xf32>
    %cst_27 = arith.constant 0.000000e+00 : f32
    %33 = vector.broadcast %cst_27 : f32 to vector<2x256xf32>
    %34 = arith.maximumf %32, %33 : vector<2x256xf32>
    %c0_28 = arith.constant 0 : index
    %c0_29 = arith.constant 0 : index
    %35 = vector.load %arg11[%c0_28, %c0_29] : memref<256x128xf32, #tpu.memory_space<vmem>>, vector<256x128xf32>
    %cst_30 = arith.constant dense<0.000000e+00> : vector<2x128xf32>
    %36 = tpu.matmul %34, %35, %cst_30 {dimension_numbers = #tpu.dot_dimension_numbers<[1], [0], [0], [1], [0, 0, 1, 1], [], []>} : vector<2x256xf32>, vector<256x128xf32>, vector<2x128xf32> -> vector<2x128xf32>
    %c0_31 = arith.constant 0 : index
    %c0_32 = arith.constant 0 : index
    %37 = vector.load %arg12[%c0_31, %c0_32] : memref<1x128xf32, #tpu.memory_space<vmem>>, vector<1x128xf32>
    %38 = vector.broadcast %37 : vector<1x128xf32> to vector<2x128xf32>
    %39 = arith.addf %36, %38 : vector<2x128xf32>
    %40 = tpu.iota {dimensions = array<i32: 1>} : vector<2x128xi32>
    %c1_i32 = arith.constant 1 : i32
    %41 = vector.broadcast %c1_i32 : i32 to vector<2x128xi32>
    %42 = arith.cmpi sge, %40, %41 : vector<2x128xi32>
    %c4_i32 = arith.constant 4 : i32
    %43 = vector.broadcast %c4_i32 : i32 to vector<2x128xi32>
    %44 = arith.cmpi slt, %40, %43 : vector<2x128xi32>
    %45 = arith.andi %42, %44 : vector<2x128xi1>
    %cst_33 = arith.constant 0.000000e+00 : f32
    %46 = vector.broadcast %cst_33 : f32 to vector<2x128xf32>
    %47 = arith.select %45, %39, %46 : vector<2x128xi1>, vector<2x128xf32>
    %48 = vector.shape_cast %47 : vector<2x128xf32> to vector<1x2x128xf32>
    %cst_34 = arith.constant dense<0.000000e+00> : vector<1xf32>
    %49 = vector.multi_reduction <add>, %48, %cst_34 [1, 2] : vector<1x2x128xf32> to vector<1xf32>
    %50 = vector.shape_cast %49 : vector<1xf32> to vector<1x1x1xf32>
    %51 = vector.extract %50[0, 0, 0] : f32 from vector<1x1x1xf32>
    %cst_35 = arith.constant 6.000000e+00 : f32
    %52 = arith.divf %51, %cst_35 : f32
    %c0_i32 = arith.constant 0 : i32
    %53 = vector.broadcast %c0_i32 : i32 to vector<2x128xi32>
    %54 = arith.cmpi eq, %40, %53 : vector<2x128xi32>
    %cst_36 = arith.constant 0.000000e+00 : f32
    %55 = vector.broadcast %cst_36 : f32 to vector<2x128xf32>
    %56 = arith.select %54, %39, %55 : vector<2x128xi1>, vector<2x128xf32>
    %cst_37 = arith.constant dense<0.000000e+00> : vector<2xf32>
    %57 = vector.multi_reduction <add>, %56, %cst_37 [1] : vector<2x128xf32> to vector<2xf32>
    %58 = vector.shape_cast %57 : vector<2xf32> to vector<2x1xf32>
    %59 = vector.broadcast %58 : vector<2x1xf32> to vector<2x128xf32>
    %60 = arith.addf %59, %39 : vector<2x128xf32>
    %61 = vector.broadcast %52 : f32 to vector<2x128xf32>
    %62 = arith.subf %60, %61 : vector<2x128xf32>
    %cst_38 = arith.constant 0.000000e+00 : f32
    %63 = vector.broadcast %cst_38 : f32 to vector<2x128xf32>
    %64 = arith.select %45, %62, %63 : vector<2x128xi1>, vector<2x128xf32>
    %c0_39 = arith.constant 0 : index
    %c0_40 = arith.constant 0 : index
    %65 = vector.load %arg13[%c0_39, %c0_40] : memref<2x128xf32, #tpu.memory_space<vmem>>, vector<2x128xf32>
    tpu.vector_store %arg13[%c0_39, %c0_40], %64 {strides = array<i32>} : memref<2x128xf32, #tpu.memory_space<vmem>>, vector<2x128xf32>,
    return
  }
}

</mosaic_0001>

<bundles_post_ra>
// kernel: dueling_dqn_forward.1
= control target key start
LH: loop header
LB: loop body
LE: loop exit
PB: predicated region body
PF: predicated region fallthrough
CT: control target
= control target key end

     0   :  { %v1643_v3 = vmov 0.0   ;;  %vm97_vm0 = vcmask 1041408   ;;  %vm1644_vm1 = vmmov 1   ;;  %vm93_vm3 = vcmask 736256   ;;  %s2654_s1 = inlined_call_operand.vmem [shape: f32[90,400], index: 1, kind: input, shape index: {}]   ;;  %s2655_s4 = inlined_call_operand.vmem [shape: f32[400,288], index: 4, kind: input, shape index: {}]   ;;  %s2656_s0 = inlined_call_operand.vmem [shape: f32[2,90], index: 0, kind: input, shape index: {}]   ;;  %s2657_s2 = inlined_call_operand.vmem [shape: f32[1,400], index: 2, kind: input, shape index: {}]   ;;  %s2658_s3 = inlined_call_operand.vmem [shape: f32[1,400], index: 3, kind: input, shape index: {}]   ;;  %s2659_s7 = inlined_call_operand.vmem [shape: f32[288,32], index: 7, kind: input, shape index: {}]   ;;  %s2660_s5 = inlined_call_operand.vmem [shape: f32[1,288], index: 5, kind: input, shape index: {}]   ;;  %s2661_s6 = inlined_call_operand.vmem [shape: f32[1,288], index: 6, kind: input, shape index: {}]   ;;  %s2662_s9 = inlined_call_operand.vmem [shape: f32[32,256], index: 9, kind: input, shape index: {}]   ;;  %s2663_s11 = inlined_call_operand.vmem [shape: f32[256,128], index: 11, kind: input, shape index: {}]   ;;  %s2664_s8 = inlined_call_operand.vmem [shape: f32[1,32], index: 8, kind: input, shape index: {}]   ;;  %s2665_s10 = inlined_call_operand.vmem [shape: f32[1,256], index: 10, kind: input, shape index: {}]   ;;  %s2666_s12 = inlined_call_operand.vmem [shape: f32[1,128], index: 12, kind: input, shape index: {}]   ;;  %s2667_s13 = inlined_call_operand.vmem [shape: f32[2,128], index: 13, kind: output, shape index: {}]  }
   0x1   :  { %v46_v0 = vld [vmem:[%s2654_s1 + $0x8] sm:$0xff]  ;;  %v45_v2 = vld [vmem:[%s2654_s1] sm:$0xff]  ;;  %174 = vmatprep.mubr.f32.mxu1 %v1643_v3  ;;  %vm1785_vm2 = vmpackc.low %vm97_vm0, %vm1644_vm1  ;;  %vm458_vm4 = vcmask 130048   ;;  %vm1646_vm5 = vmmov 0   ;;  %vm830_vm6 = vcmask 261120  }
   0x2   :  { %v50_v1 = vld [vmem:[%s2654_s1 + $0x28] sm:$0xff]  ;;  %v49_v5 = vld [vmem:[%s2654_s1 + $0x20] sm:$0xff]  ;;  %v48_v36 = vld [vmem:[%s2654_s1 + $0x18] sm:$0xff] }
   0x3   :  { %v1346_v4 = vpack.c.bf16 %v50_v1, %v46_v0  ;;  %v54_v6 = vld [vmem:[%s2654_s1 + $0x48] sm:$0xff]  ;;  %v1348_v8 = vpack.c.bf16 %v49_v5, %v45_v2  ;;  %v53_v10 = vld [vmem:[%s2654_s1 + $0x40] sm:$0xff]  ;;  %v52_v37 = vld [vmem:[%s2654_s1 + $0x38] sm:$0xff] }
   0x4   :  { %v58_v7 = vld [vmem:[%s2654_s1 + $0x68] sm:$0xff]  ;;  %v57_v11 = vld [vmem:[%s2654_s1 + $0x60] sm:$0xff]  ;;  %v311_v42 = vld [vmem:[%s2655_s4 + $0x18] sm:$0xff]  ;;  %v1372_v53 = vpack.c.bf16 %v52_v37, %v48_v36 }
   0x5   :  { %v1350_v9 = vpack.c.bf16 %v58_v7, %v54_v6  ;;  %v62_v12 = vld [vmem:[%s2654_s1 + $0x88] sm:$0xff]  ;;  %1347 = vmatprep.subr.bf16.mxu1 %v1346_v4  ;;  %v1352_v14 = vpack.c.bf16 %v57_v11, %v53_v10  ;;  %v61_v16 = vld [vmem:[%s2654_s1 + $0x80] sm:$0xff]  ;;  %v315_v45 = vld [vmem:[%s2655_s4 + $0x38] sm:$0xff] }
   0x6   :  { %v66_v13 = vld [vmem:[%s2654_s1 + $0xa8] sm:$0xff]  ;;  %1349 = vmatpush1.bf16.msra.mxu1 %v1348_v8  ;;  %v65_v17 = vld [vmem:[%s2654_s1 + $0xa0] sm:$0xff]  ;;  %v318_v46 = vld [vmem:[%s2655_s4 + $0x50] sm:$0xff] }
   0x7   :  { %1351 = vmatprep.subr.bf16.mxu1 %v1350_v9  ;;  %v1354_v15 = vpack.c.bf16 %v66_v13, %v62_v12  ;;  %v70_v18 = vld [vmem:[%s2654_s1 + $0xc8] sm:$0xff]  ;;  %v1356_v20 = vpack.c.bf16 %v65_v17, %v61_v16  ;;  %v69_v22 = vld [vmem:[%s2654_s1 + $0xc0] sm:$0xff]  ;;  %v314_v47 = vld [vmem:[%s2655_s4 + $0x30] sm:$0xff]  ;;  %v1402_v48 = vpack.c.bf16 %v318_v46, %v315_v45 }
   0x8   :  { %v74_v19 = vld [vmem:[%s2654_s1 + $0xe8] sm:$0xff]  ;;  %v73_v23 = vld [vmem:[%s2654_s1 + $0xe0] sm:$0xff]  ;;  %v47_v54 = vld [vmem:[%s2654_s1 + $0x10] sm:$0xff] }
   0x9   :  { %v1358_v21 = vpack.c.bf16 %v74_v19, %v70_v18  ;;  %v78_v24 = vld [vmem:[%s2654_s1 + $0x108] sm:$0xff]  ;;  %v1360_v26 = vpack.c.bf16 %v73_v23, %v69_v22  ;;  %v77_v28 = vld [vmem:[%s2654_s1 + $0x100] sm:$0xff]  ;;  %v51_v55 = vld [vmem:[%s2654_s1 + $0x30] sm:$0xff] }
   0xa   :  { %1353 = vmatpush1.bf16.msra.mxu1 %v1352_v14  ;;  %v82_v25 = vld [vmem:[%s2654_s1 + $0x128] sm:$0xff]  ;;  %v81_v29 = vld [vmem:[%s2654_s1 + $0x120] sm:$0xff]  ;;  %v56_v56 = vld [vmem:[%s2654_s1 + $0x58] sm:$0xff]  ;;  %v1374_v1 = vpack.c.bf16 %v51_v55, %v47_v54 }
   0xb   :  { %1355 = vmatprep.subr.bf16.mxu1 %v1354_v15  ;;  %v1362_v27 = vpack.c.bf16 %v82_v25, %v78_v24  ;;  %v86_v30 = vld [vmem:[%s2654_s1 + $0x148] sm:$0xff]  ;;  %v85_v33 = vld [vmem:[%s2654_s1 + $0x140] sm:$0xff]  ;;  %v1364_v35 = vpack.c.bf16 %v81_v29, %v77_v28  ;;  %v60_v58 = vld [vmem:[%s2654_s1 + $0x78] sm:$0xff] }
   0xc   :  { %v90_v31 = vld [vmem:[%s2654_s1 + $0x168] sm:$0x3]  ;;  %v89_v34 = vld [vmem:[%s2654_s1 + $0x160] sm:$0x3]  ;;  %v323_v61 = vld [vmem:[%s2655_s4 + $0x78] sm:$0xff]  ;;  %v1376_v2 = vpack.c.bf16 %v60_v58, %v56_v56 }
   0xd   :  { %v309_v38 = vld [vmem:[%s2655_s4 + $0x8] sm:$0xff]  ;;  %v1366_v39 = vpack.c.bf16 %v90_v31, %v86_v30  ;;  %v312_v40 = vld [vmem:[%s2655_s4 + $0x20] sm:$0xff]  ;;  %v1369_v52 = vpack.c.bf16 %v89_v34, %v85_v33  ;;  %v327_v62 = vld [vmem:[%s2655_s4 + $0x98] sm:$0xff] }
   0xe   :  { %1357 = vmatpush1.bf16.msra.mxu1 %v1356_v20  ;;  %v308_v41 = vld [vmem:[%s2655_s4] sm:$0xff]  ;;  %v1398_v43 = vpack.c.bf16 %v312_v40, %v309_v38  ;;  %v317_v49 = vld [vmem:[%s2655_s4 + $0x48] sm:$0xff]  ;;  %v330_v63 = vld [vmem:[%s2655_s4 + $0xb0] sm:$0xff] }
   0xf   :  { %1359 = vmatprep.subr.bf16.mxu1 %v1358_v21  ;;  %v1400_v44 = vpack.c.bf16 %v311_v42, %v308_v41  ;;  %v321_v50 = vld [vmem:[%s2655_s4 + $0x68] sm:$0xff]  ;;  %v324_v51 = vld [vmem:[%s2655_s4 + $0x80] sm:$0xff]  ;;  %v1404_v57 = vpack.c.bf16 %v317_v49, %v314_v47  ;;  %v55_v4 = vld [vmem:[%s2654_s1 + $0x50] sm:$0xff]  ;;  %v1410_v9 = vpack.c.bf16 %v330_v63, %v327_v62 }
  0x10   :  { %1399 = vmatprep.subr.bf16.mxu0 %v1398_v43  ;;  %v1406_v59 = vpack.c.bf16 %v324_v51, %v321_v50  ;;  %v320_v60 = vld [vmem:[%s2655_s4 + $0x60] sm:$0xff]  ;;  %v59_v5 = vld [vmem:[%s2654_s1 + $0x70] sm:$0xff]  ;;  %v64_v6 = vld [vmem:[%s2654_s1 + $0x98] sm:$0xff] }
  0x11   :  { %1401 = vmatpush1.bf16.msra.mxu0 %v1400_v44  ;;  %v1862_v0 = vld [vmem:[%s2656_s0] sm:$0x3]  ;;  %v1408_v7 = vpack.c.bf16 %v323_v61, %v320_v60  ;;  %v68_v8 = vld [vmem:[%s2654_s1 + $0xb8] sm:$0xff]  ;;  %v326_v10 = vld [vmem:[%s2655_s4 + $0x90] sm:$0xff]  ;;  %v1378_v14 = vpack.c.bf16 %v59_v5, %v55_v4 }
  0x12   :  { %1361 = vmatpush1.bf16.msra.mxu1 %v1360_v26  ;;  %1403 = vmatprep.subr.bf16.mxu0 %v1402_v48  ;;  %v329_v11 = vld [vmem:[%s2655_s4 + $0xa8] sm:$0xff]  ;;  %v336_v13 = vld [vmem:[%s2655_s4 + $0xe0] sm:$0xff]  ;;  %v1380_v15 = vpack.c.bf16 %v68_v8, %v64_v6  ;;  %v63_v16 = vld [vmem:[%s2654_s1 + $0x90] sm:$0xff] }
  0x13   :  { %1363 = vmatprep.subr.bf16.mxu1 %v1362_v27  ;;  %v333_v12 = vld [vmem:[%s2655_s4 + $0xc8] sm:$0xff]  ;;  %v67_v17 = vld [vmem:[%s2654_s1 + $0xb0] sm:$0xff]  ;;  %v72_v18 = vld [vmem:[%s2654_s1 + $0xd8] sm:$0xff]  ;;  %v1412_v19 = vpack.c.bf16 %v329_v11, %v326_v10 }
  0x14   :  { %v76_v20 = vld [vmem:[%s2654_s1 + $0xf8] sm:$0xff]  ;;  %v1414_v21 = vpack.c.bf16 %v336_v13, %v333_v12  ;;  %v332_v22 = vld [vmem:[%s2655_s4 + $0xc0] sm:$0xff]  ;;  %v342_v25 = vld [vmem:[%s2655_s4 + $0x110] sm:$0xff]  ;;  %v1382_v26 = vpack.c.bf16 %v67_v17, %v63_v16 }
  0x15   :  { %1405 = vmatpush1.bf16.msra.mxu0 %v1404_v57  ;;  %v335_v23 = vld [vmem:[%s2655_s4 + $0xd8] sm:$0xff]  ;;  %v1384_v27 = vpack.c.bf16 %v76_v20, %v72_v18  ;;  %v71_v28 = vld [vmem:[%s2654_s1 + $0xd0] sm:$0xff]  ;;  %v341_v36 = vld [vmem:[%s2655_s4 + $0x108] sm:$0xff] }
  0x16   :  { %1365 = vmatpush1.bf16.msra.mxu1 %v1364_v35  ;;  %1407 = vmatprep.subr.bf16.mxu0 %v1406_v59  ;;  %v339_v24 = vld [vmem:[%s2655_s4 + $0xf8] sm:$0xff]  ;;  %v75_v29 = vld [vmem:[%s2654_s1 + $0xf0] sm:$0xff]  ;;  %v1416_v31 = vpack.c.bf16 %v335_v23, %v332_v22  ;;  %v345_v37 = vld [vmem:[%s2655_s4 + $0x128] sm:$0xff] }
  0x17   :  { %1368 = vmatprep.subr.msk.bf16.mxu1 %vm1785_vm2, %v1366_v39  ;;  %v80_v30 = vld [vmem:[%s2654_s1 + $0x118] sm:$0xff]  ;;  %v1418_v34 = vpack.c.bf16 %v342_v25, %v339_v24  ;;  %v338_v35 = vld [vmem:[%s2655_s4 + $0xf0] sm:$0xff]  ;;  %v348_v38 = vld [vmem:[%s2655_s4 + $0x140] sm:$0xff]  ;;  %v1386_v39 = vpack.c.bf16 %v75_v29, %v71_v28 }
  0x18   :  { %v84_v33 = vld [vmem:[%s2654_s1 + $0x138] sm:$0xff]  ;;  %v79_v41 = vld [vmem:[%s2654_s1 + $0x110] sm:$0xff]  ;;  %v1420_v44 = vpack.c.bf16 %v341_v36, %v338_v35  ;;  %v1422_v46 = vpack.c.bf16 %v348_v38, %v345_v37  ;;  %v344_v47 = vld [vmem:[%s2655_s4 + $0x120] sm:$0xff] }
  0x19   :  { %1409 = vmatpush1.bf16.msra.mxu0 %v1408_v7  ;;  %v1388_v40 = vpack.c.bf16 %v84_v33, %v80_v30  ;;  %v83_v42 = vld [vmem:[%s2654_s1 + $0x130] sm:$0xff]  ;;  %v88_v43 = vld [vmem:[%s2654_s1 + $0x158] sm:$0xff]  ;;  %v353_v58 = vld [vmem:[%s2655_s4 + $0x168] sm:$0xff] }
  0x1a   :  { %1371 = vmatpush1.bf16.msk.msra.mxu1 %vm1785_vm2, %v1369_v52  ;;  %1411 = vmatprep.subr.bf16.mxu0 %v1410_v9  ;;  %v92_v45 = vld [vmem:[%s2654_s1 + $0x178] sm:$0x3]  ;;  %v354_v50 = vld [vmem:[%s2655_s4 + $0x170] sm:$0xff]  ;;  %v1390_v51 = vpack.c.bf16 %v83_v42, %v79_v41  ;;  %v361_v60 = vld [vmem:[%s2655_s4 + $0x1a8] sm:$0xff] }
  0x1b   :  { %1373 = vmatprep.subr.bf16.mxu1 %v1372_v53  ;;  %v347_v48 = vld [vmem:[%s2655_s4 + $0x138] sm:$0xff]  ;;  %v1392_v52 = vpack.c.bf16 %v92_v45, %v88_v43  ;;  %v87_v53 = vld [vmem:[%s2654_s1 + $0x150] sm:$0xff]  ;;  %v357_v61 = vld [vmem:[%s2655_s4 + $0x188] sm:$0xff] }
  0x1c   :  { %v351_v49 = vld [vmem:[%s2655_s4 + $0x158] sm:$0xff]  ;;  %v91_v54 = vld [vmem:[%s2654_s1 + $0x170] sm:$0x3]  ;;  %v1424_v55 = vpack.c.bf16 %v347_v48, %v344_v47  ;;  %v360_v62 = vld [vmem:[%s2655_s4 + $0x1a0] sm:$0xff] }
  0x1d   :  { %1215 = vmatmul.mubr.msk.f32.vlgmr.msra.gmra.mrb[0].mxu1 %vm93_vm3, %v1862_v0  ;;  %1413 = vmatpush1.bf16.msra.mxu0 %v1412_v19  ;;  %v350_v56 = vld [vmem:[%s2655_s4 + $0x150] sm:$0xff]  ;;  %v1426_v57 = vpack.c.bf16 %v354_v50, %v351_v49  ;;  %v1395_v63 = vpack.c.bf16 %v91_v54, %v87_v53  ;;  %v356_v4 = vld [vmem:[%s2655_s4 + $0x180] sm:$0xff]  ;;  %v313_v6 = vld [vmem:[%s2655_s4 + $0x28] sm:$0xff]  ;;  %v1430_v7 = vpack.c.bf16 %v360_v62, %v357_v61 }
  0x1e   :  { %1375 = vmatpush1.bf16.msra.mxu1 %v1374_v1  ;;  %245 = vmatprep.mubr.f32.mxu1 %v1643_v3  ;;  %v358_v59 = vld [vmem:[%s2655_s4 + $0x190] sm:$0xff]  ;;  %v1428_v1 = vpack.c.bf16 %v353_v58, %v350_v56  ;;  %v359_v8 = vld [vmem:[%s2655_s4 + $0x198] sm:$0xff]  ;;  %v364_v9 = vld [vmem:[%s2655_s4 + $0x1c0] sm:$0xff] }
  0x1f   :  { %1377 = vmatprep.subr.bf16.mxu1 %v1376_v2  ;;  %1415 = vmatprep.subr.bf16.mxu0 %v1414_v21  ;;  %v1498_v2 = vpack.c.bf16 %v361_v60, %v358_v59  ;;  %v310_v5 = vld [vmem:[%s2655_s4 + $0x10] sm:$0xff]  ;;  %v367_v10 = vld [vmem:[%s2655_s4 + $0x1d8] sm:$0xff]  ;;  %v316_v17 = vld [vmem:[%s2655_s4 + $0x40] sm:$0xff] }
  0x20   :  { %v363_v11 = vld [vmem:[%s2655_s4 + $0x1b8] sm:$0xff]  ;;  %v366_v12 = vld [vmem:[%s2655_s4 + $0x1d0] sm:$0xff]  ;;  %v1500_v13 = vpack.c.bf16 %v313_v6, %v310_v5  ;;  %v365_v19 = vld [vmem:[%s2655_s4 + $0x1c8] sm:$0xff] }
  0x21   :  { %1417 = vmatpush1.bf16.msra.mxu0 %v1416_v31  ;;  %v362_v16 = vld [vmem:[%s2655_s4 + $0x1b0] sm:$0xff]  ;;  %v319_v18 = vld [vmem:[%s2655_s4 + $0x58] sm:$0xff]  ;;  %v1434_v32 = vpack.c.bf16 %v366_v12, %v363_v11  ;;  %v373_v21 = vld [vmem:[%s2655_s4 + $0x208] sm:$0xff] }
  0x22   :  { %1379 = vmatpush1.bf16.msra.mxu1 %v1378_v14  ;;  %1419 = vmatprep.subr.bf16.mxu0 %v1418_v34  ;;  %v1432_v14 = vpack.c.bf16 %v359_v8, %v356_v4  ;;  %v370_v20 = vld [vmem:[%s2655_s4 + $0x1f0] sm:$0xff]  ;;  %v369_v22 = vld [vmem:[%s2655_s4 + $0x1e8] sm:$0xff]  ;;  %v372_v23 = vld [vmem:[%s2655_s4 + $0x200] sm:$0xff]  ;;  %v1504_v24 = vpack.c.bf16 %v319_v18, %v316_v17  ;;  %v1436_v25 = vpack.c.bf16 %v365_v19, %v362_v16 }
  0x23   :  { %1381 = vmatprep.subr.bf16.mxu1 %v1380_v15  ;;  %v1502_v15 = vpack.c.bf16 %v367_v10, %v364_v9  ;;  %v325_v28 = vld [vmem:[%s2655_s4 + $0x88] sm:$0xff]  ;;  %v1438_v29 = vpack.c.bf16 %v372_v23, %v369_v22  ;;  %v371_v30 = vld [vmem:[%s2655_s4 + $0x1f8] sm:$0xff]  ;;  %v376_v31 = vld [vmem:[%s2655_s4 + $0x220] sm:$0xff] }
  0x24   :  { %v379_v33 = vld [vmem:[%s2655_s4 + $0x238] sm:$0xff]  ;;  %v378_v35 = vld [vmem:[%s2655_s4 + $0x230] sm:$0xff]  ;;  %v377_v43 = vld [vmem:[%s2655_s4 + $0x228] sm:$0xff] }
  0x25   :  { %1421 = vmatpush1.bf16.msra.mxu0 %v1420_v44  ;;  %v375_v34 = vld [vmem:[%s2655_s4 + $0x218] sm:$0xff]  ;;  %v1510_v38 = vpack.c.bf16 %v379_v33, %v376_v31  ;;  %v382_v44 = vld [vmem:[%s2655_s4 + $0x250] sm:$0xff]  ;;  %v385_v45 = vld [vmem:[%s2655_s4 + $0x268] sm:$0xff] }
  0x26   :  { %1383 = vmatpush1.bf16.msra.mxu1 %v1382_v26  ;;  %1423 = vmatprep.subr.bf16.mxu0 %v1422_v46  ;;  %v1506_v26 = vpack.c.bf16 %v373_v21, %v370_v20  ;;  %v331_v41 = vld [vmem:[%s2655_s4 + $0xb8] sm:$0xff]  ;;  %v1442_v42 = vpack.c.bf16 %v378_v35, %v375_v34  ;;  %v381_v46 = vld [vmem:[%s2655_s4 + $0x248] sm:$0xff]  ;;  %v384_v47 = vld [vmem:[%s2655_s4 + $0x260] sm:$0xff]  ;;  %v1514_v50 = vpack.c.bf16 %v385_v45, %v382_v44  ;;  %v1645_v34 = vmov 0.0|0.0  }
  0x27   :  { %1385 = vmatprep.subr.bf16.mxu1 %v1384_v27  ;;  %v368_v27 = vld [vmem:[%s2655_s4 + $0x1e0] sm:$0xff]  ;;  %v337_v53 = vld [vmem:[%s2655_s4 + $0xe8] sm:$0xff]  ;;  %v1446_v54 = vpack.c.bf16 %v384_v47, %v381_v46  ;;  %v387_v58 = vld [vmem:[%s2655_s4 + $0x278] sm:$0xff]  ;;  %v254_v35 = vlaneseq }
  0x28   :  { %v1440_v37 = vpack.c.bf16 %v371_v30, %v368_v27  ;;  %v388_v56 = vld [vmem:[%s2655_s4 + $0x280] sm:$0xff]  ;;  %v390_v59 = vld [vmem:[%s2655_s4 + $0x290] sm:$0xff]  ;;  %v389_v5 = vld [vmem:[%s2655_s4 + $0x288] sm:$0xff] }
  0x29   :  { %1425 = vmatpush1.bf16.msra.mxu0 %v1424_v55  ;;  %v383_v55 = vld [vmem:[%s2655_s4 + $0x258] sm:$0xff]  ;;  %v386_v4 = vld [vmem:[%s2655_s4 + $0x270] sm:$0xff]  ;;  %v393_v8 = vld [vmem:[%s2655_s4 + $0x2a8] sm:$0xff] }
  0x2a   :  { %1387 = vmatpush1.bf16.msra.mxu1 %v1386_v39  ;;  %1427 = vmatprep.subr.bf16.mxu0 %v1426_v57  ;;  %v374_v39 = vld [vmem:[%s2655_s4 + $0x210] sm:$0xff]  ;;  %v391_v57 = vld [vmem:[%s2655_s4 + $0x298] sm:$0xff]  ;;  %v396_v9 = vld [vmem:[%s2655_s4 + $0x2c0] sm:$0xff] }
  0x2b   :  { %1389 = vmatprep.subr.bf16.mxu1 %v1388_v40  ;;  %v328_v40 = vld [vmem:[%s2655_s4 + $0xa0] sm:$0xff]  ;;  %v1444_v49 = vpack.c.bf16 %v377_v43, %v374_v39  ;;  %v1518_v62 = vpack.c.bf16 %v391_v57, %v388_v56  ;;  %v394_v10 = vld [vmem:[%s2655_s4 + $0x2b0] sm:$0xff]  ;;  %v1454_v11 = vpack.c.bf16 %v396_v9, %v393_v8  ;;  %v397_v12 = vld [vmem:[%s2655_s4 + $0x2c8] sm:$0xff] }
  0x2c   :  { %v1512_v48 = vpack.c.bf16 %v331_v41, %v328_v40  ;;  %v346_v16 = vld [vmem:[%s2655_s4 + $0x130] sm:$0xff]  ;;  %v349_v17 = vld [vmem:[%s2655_s4 + $0x148] sm:$0xff]  ;;  %v399_v19 = vld [vmem:[%s2655_s4 + $0x2d8] sm:$0xff] }
  0x2d   :  { %1429 = vmatpush1.bf16.msra.mxu0 %v1428_v1  ;;  %v343_v1 = vld [vmem:[%s2655_s4 + $0x118] sm:$0xff]  ;;  %v402_v20 = vld [vmem:[%s2655_s4 + $0x2f0] sm:$0xff]  ;;  %v400_v21 = vld [vmem:[%s2655_s4 + $0x2e0] sm:$0xff] }
  0x2e   :  { %1391 = vmatpush1.bf16.msra.mxu1 %v1390_v51  ;;  %1431 = vmatprep.subr.bf16.mxu0 %v1430_v7  ;;  %v380_v51 = vld [vmem:[%s2655_s4 + $0x240] sm:$0xff]  ;;  %v1452_v7 = vpack.c.bf16 %v389_v5, %v386_v4  ;;  %v1458_v22 = vpack.c.bf16 %v402_v20, %v399_v19  ;;  %v403_v23 = vld [vmem:[%s2655_s4 + $0x2f8] sm:$0xff]  ;;  %v405_v30 = vld [vmem:[%s2655_s4 + $0x308] sm:$0xff] }
  0x2f   :  { %1394 = vmatprep.subr.msk.bf16.mxu1 %vm1785_vm2, %v1392_v52  ;;  %v334_v52 = vld [vmem:[%s2655_s4 + $0xd0] sm:$0xff]  ;;  %v1448_v61 = vpack.c.bf16 %v383_v55, %v380_v51  ;;  %v408_v31 = vld [vmem:[%s2655_s4 + $0x320] sm:$0xff]  ;;  %v407_v51 = vld [vmem:[%s2655_s4 + $0x318] sm:$0xff] }
  0x30   :  { %v1516_v60 = vpack.c.bf16 %v337_v53, %v334_v52  ;;  %v1462_v33 = vpack.c.bf16 %v408_v31, %v405_v30  ;;  %v2197_v40 = vld [vmem:[%s2658_s3] sm:$0xf]  ;;  %v406_v52 = vld [vmem:[%s2655_s4 + $0x310] sm:$0xff]  ;;  %v409_v53 = vld [vmem:[%s2655_s4 + $0x328] sm:$0xff] }
  0x31   :  { %1433 = vmatpush1.bf16.msra.mxu0 %v1432_v14  ;;  %v1522_v14 = vpack.c.bf16 %v397_v12, %v394_v10  ;;  %v411_v55 = vld [vmem:[%s2655_s4 + $0x338] sm:$0xff]  ;;  %v414_v56 = vld [vmem:[%s2655_s4 + $0x350] sm:$0xff]  ;;  %v417_v4 = vld [vmem:[%s2655_s4 + $0x368] sm:$0xff] }
  0x32   :  { %1397 = vmatpush1.bf16.msk.msra.mxu1 %vm1785_vm2, %v1395_v63  ;;  %1435 = vmatprep.subr.bf16.mxu0 %v1434_v32  ;;  %v340_v63 = vld [vmem:[%s2655_s4 + $0x100] sm:$0xff]  ;;  %v1524_v32 = vpack.c.bf16 %v349_v17, %v346_v16  ;;  %v419_v10 = vld [vmem:[%s2655_s4 + $0x378] sm:$0xff]  ;;  %v421_v12 = vld [vmem:[%s2655_s4 + $0x388] sm:$0xff] }
  0x33   :  { %1499 = vmatprep.subr.bf16.mxu1 %v1498_v2  ;;  %v1450_v2 = vpack.c.bf16 %v390_v59, %v387_v58  ;;  %v1520_v6 = vpack.c.bf16 %v343_v1, %v340_v63  ;;  %v1531_v59 = vpack.c.bf16 %v409_v53, %v406_v52  ;;  %v413_v63 = vld [vmem:[%s2655_s4 + $0x348] sm:$0xff]  ;;  %v412_v1 = vld [vmem:[%s2655_s4 + $0x340] sm:$0xff]  ;;  %v422_v17 = vld [vmem:[%s2655_s4 + $0x390] sm:$0xff] }
  0x34   :  { %v420_v5 = vld [vmem:[%s2655_s4 + $0x380] sm:$0xff]  ;;  %v427_v20 = vld [vmem:[%s2655_s4 + $0x3b8] sm:$0xff]  ;;  %v438_v31 = vld [vmem:[%s2655_s4 + $0x410] sm:$0xff] }
  0x35   :  { %1218 = vmatmul.mubr.msk.f32.vlgmr.msra.gmra.mrb[2].mxu1 %vm93_vm3, %v1862_v0  ;;  %v322_v0 = vld [vmem:[%s2655_s4 + $0x70] sm:$0xff]  ;;  %1437 = vmatpush1.bf16.msra.mxu0 %v1436_v25  ;;  %v401_v25 = vld [vmem:[%s2655_s4 + $0x2e8] sm:$0xff]  ;;  %v416_v8 = vld [vmem:[%s2655_s4 + $0x360] sm:$0xff]  ;;  %v1470_v9 = vpack.c.bf16 %v420_v5, %v417_v4 }
  0x36   :  { %1501 = vmatpush3.bf16.msra.mxu1 %v1500_v13  ;;  %v1508_v36 = vpack.c.bf16 %v325_v28, %v322_v0  ;;  %1439 = vmatprep.subr.bf16.mxu0 %v1438_v29  ;;  %v392_v13 = vld [vmem:[%s2655_s4 + $0x2a0] sm:$0xff]  ;;  %v355_v28 = vld [vmem:[%s2655_s4 + $0x178] sm:$0xff] }
  0x37   :  { %1503 = vmatprep.subr.bf16.mxu1 %v1502_v15  ;;  %v395_v15 = vld [vmem:[%s2655_s4 + $0x2b8] sm:$0xff]  ;;  %v352_v0 = vld [vmem:[%s2655_s4 + $0x160] sm:$0xff] }
  0x38   :  { %v1456_v18 = vpack.c.bf16 %v395_v15, %v392_v13  ;;  %v1528_v29 = vpack.c.bf16 %v355_v28, %v352_v0  ;;  %v423_v13 = vld [vmem:[%s2655_s4 + $0x398] sm:$0xff]  ;;  %v1472_v15 = vpack.c.bf16 %v419_v10, %v416_v8  ;;  %v424_v19 = vld [vmem:[%s2655_s4 + $0x3a0] sm:$0xff]  ;;  %v430_v28 = vld [vmem:[%s2655_s4 + $0x3d0] sm:$0xff] }
  0x39   :  { %1441 = vmatpush1.bf16.msra.mxu0 %v1440_v37  ;;  %v431_v0 = vld [vmem:[%s2655_s4 + $0x3d8] sm:$0xff]  ;;  %v449_v8 = vld [vmem:[%s2655_s4 + $0x468] sm:$0xff] }
  0x3a   :  { %1505 = vmatpush3.bf16.msra.mxu1 %v1504_v24  ;;  %1443 = vmatprep.subr.bf16.mxu0 %v1442_v42  ;;  %v398_v24 = vld [vmem:[%s2655_s4 + $0x2d0] sm:$0xff]  ;;  %v435_v30 = vld [vmem:[%s2655_s4 + $0x3f8] sm:$0xff] }
  0x3b   :  { %1507 = vmatprep.subr.bf16.mxu1 %v1506_v26  ;;  %v1526_v26 = vpack.c.bf16 %v403_v23, %v400_v21  ;;  %v1460_v27 = vpack.c.bf16 %v401_v25, %v398_v24  ;;  %v429_v21 = vld [vmem:[%s2655_s4 + $0x3c8] sm:$0xff]  ;;  %v1540_v24 = vpack.c.bf16 %v427_v20, %v424_v19  ;;  %v428_v25 = vld [vmem:[%s2655_s4 + $0x3c0] sm:$0xff]  ;;  %v451_v10 = vld [vmem:[%s2655_s4 + $0x478] sm:$0xff] }
  0x3c   :  { %v457_v19 = vld [vmem:[%s2655_s4 + $0x4a8] sm:$0xff] }
  0x3d   :  { %1445 = vmatpush1.bf16.msra.mxu0 %v1444_v49  ;;  %v404_v49 = vld [vmem:[%s2655_s4 + $0x300] sm:$0xff] }
  0x3e   :  { %1509 = vmatpush3.bf16.msra.mxu1 %v1508_v36  ;;  %1447 = vmatprep.subr.bf16.mxu0 %v1446_v54  ;;  %v2181_v36 = vshrl.u32 %v254_v35, 7  ;;  %v1464_v58 = vpack.c.bf16 %v407_v51, %v404_v49  ;;  %v444_v49 = vld [vmem:[%s2655_s4 + $0x440] sm:$0xff] }
  0x3f   :  { %1511 = vmatprep.subr.bf16.mxu1 %v1510_v38  ;;  %v2189_v38 = vld [vmem:[%s2657_s2] sm:$0xf] }
  0x40   :  { %v2184_v37 = vsub.s32 0, %v2181_v36  ;;  %v2192_v39 = vsub.s32 1, %v2181_v36 }
  0x41   :  { %1449 = vmatpush1.bf16.msra.mxu0 %v1448_v61 }
  0x42   :  { %1513 = vmatpush3.bf16.msra.mxu1 %v1512_v48  ;;  %1451 = vmatprep.subr.bf16.mxu0 %v1450_v2  ;;  %v257_v41 = vrot.slane %v2189_v38, %v2184_v37  ;;  %v261_v42 = vrot.slane %v2189_v38, %v2192_v39  ;;  %v283_v43 = vrot.slane %v2197_v40, %v2184_v37  ;;  %v415_v2 = vld [vmem:[%s2655_s4 + $0x358] sm:$0xff] }
  0x43   :  { %1515 = vmatprep.subr.bf16.mxu1 %v1514_v50  ;;  %v287_v45 = vrot.slane %v2197_v40, %v2192_v39 }
  0x45   :  { %1453 = vmatpush1.bf16.msra.mxu0 %v1452_v7  ;;  %v1534_v7 = vpack.c.bf16 %v415_v2, %v412_v1  ;;  %v450_v1 = vld [vmem:[%s2655_s4 + $0x470] sm:$0xff] }
  0x46   :  { %1517 = vmatpush3.bf16.msra.mxu1 %v1516_v60  ;;  %1455 = vmatprep.subr.bf16.mxu0 %v1454_v11  ;;  %v410_v60 = vld [vmem:[%s2655_s4 + $0x330] sm:$0xff] }
  0x47   :  { %1519 = vmatprep.subr.bf16.mxu1 %v1518_v62  ;;  %v1466_v62 = vpack.c.bf16 %v414_v56, %v411_v55  ;;  %v418_v11 = vld [vmem:[%s2655_s4 + $0x370] sm:$0xff]  ;;  %v440_v55 = vld [vmem:[%s2655_s4 + $0x420] sm:$0xff] }
  0x48   :  { %v1537_v16 = vpack.c.bf16 %v421_v12, %v418_v11  ;;  %v453_v11 = vld [vmem:[%s2655_s4 + $0x488] sm:$0xff] }
  0x49   :  { %1457 = vmatpush1.bf16.msra.mxu0 %v1456_v18 }
  0x4a   :  { %1521 = vmatpush3.bf16.msra.mxu1 %v1520_v6  ;;  %1459 = vmatprep.subr.bf16.mxu0 %v1458_v22  ;;  %v1468_v6 = vpack.c.bf16 %v413_v63, %v410_v60  ;;  %v432_v22 = vld [vmem:[%s2655_s4 + $0x3e0] sm:$0xff]  ;;  %v445_v60 = vld [vmem:[%s2655_s4 + $0x448] sm:$0xff]  ;;  %v447_v63 = vld [vmem:[%s2655_s4 + $0x458] sm:$0xff] }
  0x4b   :  { %1523 = vmatprep.subr.bf16.mxu1 %v1522_v14  ;;  %v426_v14 = vld [vmem:[%s2655_s4 + $0x3b0] sm:$0xff] }
  0x4c   :  { %v1474_v18 = vpack.c.bf16 %v426_v14, %v423_v13  ;;  %v452_v14 = vld [vmem:[%s2655_s4 + $0x480] sm:$0xff] }
  0x4d   :  { %1461 = vmatpush1.bf16.msra.mxu0 %v1460_v27  ;;  %v1478_v27 = vpack.c.bf16 %v432_v22, %v429_v21 }
  0x4e   :  { %1525 = vmatpush3.bf16.msra.mxu1 %v1524_v32  ;;  %1463 = vmatprep.subr.bf16.mxu0 %v1462_v33  ;;  %v425_v32 = vld [vmem:[%s2655_s4 + $0x3a8] sm:$0xff]  ;;  %v1480_v33 = vpack.c.bf16 %v431_v0, %v428_v25  ;;  %v787_v25 = vld [vmem:[%s2659_s7] sm:$0xff]  ;;  %v805_v0 = vld [vmem:[%s2659_s7 + $0x90] sm:$0xff] }
  0x4f   :  { %1527 = vmatprep.subr.bf16.mxu1 %v1526_v26  ;;  %v1476_v23 = vpack.c.bf16 %v425_v32, %v422_v17  ;;  %v268_v26 = vsub.s32 3, %v2181_v36  ;;  %v454_v32 = vld [vmem:[%s2655_s4 + $0x490] sm:$0xff] }
  0x51   :  { %v295_v51 = vrot.slane %v2197_v40, %v268_v26 }
  0x52   :  { %1529 = vmatpush3.bf16.msra.mxu1 %v1528_v29  ;;  %v433_v29 = vld [vmem:[%s2655_s4 + $0x3e8] sm:$0xff] }
  0x53   :  { %1530 = vmatprep.subr.bf16.mxu1 %v1645_v34 }
  0xf0   :  { %v176_v44 = vpop.f32.mrb[0].mxu1 }
  0xf1   :  { %v274_v46 = vmul.f32 %v257_v41, %v176_v44  ;;  %v178_v47 = vpop.f32.mrb[1].mxu1  ;;  %v1543_v41 = vpack.c.bf16 %v433_v29, %v430_v28  ;;  %v1482_v44 = vpack.c.bf16 %v438_v31, %v435_v30  ;;  %v806_v28 = vld [vmem:[%s2659_s7 + $0x98] sm:$0xff]  ;;  %v789_v31 = vld [vmem:[%s2659_s7 + $0x10] sm:$0xff] }
  0xf2   :  { %v275_v48 = vmul.f32 %v261_v42, %v178_v47  ;;  %v434_v42 = vld [vmem:[%s2655_s4 + $0x3f0] sm:$0xff]  ;;  %v439_v47 = vld [vmem:[%s2655_s4 + $0x418] sm:$0xff]  ;;  %v1561_v30 = vpack.c.bf16 %v806_v28, %v805_v0 }
  0xf3   :  { %v300_v50 = vadd.f32 %v283_v43, %v274_v46  ;;  %v269_v43 = vrot.slane %v2189_v38, %v268_v26  ;;  %v436_v46 = vld [vmem:[%s2655_s4 + $0x400] sm:$0xff] }
  0xf4   :  { %v301_v54 = vadd.f32 %v287_v45, %v275_v48  ;;  %v437_v45 = vld [vmem:[%s2655_s4 + $0x408] sm:$0xff] }
  0xf5   :  { %v304_v61 = vmax.f32 %v300_v50, 0.0  ;;  %v441_v48 = vld [vmem:[%s2655_s4 + $0x428] sm:$0xff]  ;;  %v1484_v53 = vpack.c.bf16 %v437_v45, %v434_v42  ;;  %v791_v45 = vld [vmem:[%s2659_s7 + $0x20] sm:$0xff] }
  0xf6   :  { %v305_v57 = vmax.f32 %v301_v54, 0.0  ;;  %v1546_v54 = vpack.c.bf16 %v439_v47, %v436_v46  ;;  %v808_v42 = vld [vmem:[%s2659_s7 + $0xa8] sm:$0xff]  ;;  %v809_v47 = vld [vmem:[%s2659_s7 + $0xb0] sm:$0xff] }
  0xf7   :  { %v792_v46 = vld [vmem:[%s2659_s7 + $0x28] sm:$0xff] }
  0xf8   :  { %526 = vmatprep.mubr.f32.mxu0 %v305_v57  ;;  %668 = vmatprep.mubr.f32.mxu1 %v305_v57  ;;  %v1486_v57 = vpack.c.bf16 %v444_v49, %v441_v48  ;;  %v810_v48 = vld [vmem:[%s2659_s7 + $0xb8] sm:$0xff]  ;;  %v1567_v49 = vpack.c.bf16 %v792_v46, %v791_v45 }
  0xf9   :  { %527 = vmatmul.mubr.f32.vlgmr.msra.gmra.mrb[0].mxu0 %v304_v61  ;;  %669 = vmatmul.mubr.f32.vlgmr.msra.gmra.mrb[4].mxu1 %v304_v61  ;;  %v2336_v61 = vsub.s32 2, %v2181_v36  ;;  %v446_v36 = vld [vmem:[%s2655_s4 + $0x450] sm:$0xff] }
  0xfa   :  { %1465 = vmatpush1.bf16.msra.mxu0 %v1464_v58  ;;  %1532 = vmatpush1.bf16.msra.mxu1 %v1531_v59  ;;  %v443_v58 = vld [vmem:[%s2655_s4 + $0x438] sm:$0xff]  ;;  %v442_v59 = vld [vmem:[%s2655_s4 + $0x430] sm:$0xff]  ;;  %v1492_v12 = vpack.c.bf16 %v449_v8, %v446_v36  ;;  %v816_v36 = vld [vmem:[%s2659_s7 + $0xe8] sm:$0xff] }
  0xfb   :  { %1467 = vmatprep.subr.bf16.mxu0 %v1466_v62  ;;  %1533 = vmatprep.subr.bf16.mxu1 %v1645_v34  ;;  %v1488_v2 = vpack.c.bf16 %v443_v58, %v440_v55  ;;  %v1549_v4 = vpack.c.bf16 %v445_v60, %v442_v59  ;;  %v796_v58 = vld [vmem:[%s2659_s7 + $0x48] sm:$0xff]  ;;  %v813_v59 = vld [vmem:[%s2659_s7 + $0xd0] sm:$0xff]  ;;  %v814_v60 = vld [vmem:[%s2659_s7 + $0xd8] sm:$0xff] }
  0xfc   :  { %v800_v8 = vld [vmem:[%s2659_s7 + $0x68] sm:$0xff] }
  0xfe   :  { %1469 = vmatpush1.bf16.msra.mxu0 %v1468_v6  ;;  %1535 = vmatpush1.bf16.msra.mxu1 %v1534_v7  ;;  %v265_v6 = vrot.slane %v2189_v38, %v2336_v61  ;;  %v1490_v7 = vpack.c.bf16 %v450_v1, %v447_v63  ;;  %v456_v38 = vld [vmem:[%s2655_s4 + $0x4a0] sm:$0xff]  ;;  %v1577_v63 = vpack.c.bf16 %v814_v60, %v813_v59  ;;  %v797_v1 = vld [vmem:[%s2659_s7 + $0x50] sm:$0xff] }
  0xff   :  { %1471 = vmatprep.subr.bf16.mxu0 %v1470_v9  ;;  %1536 = vmatprep.subr.bf16.mxu1 %v1645_v34  ;;  %v448_v9 = vld [vmem:[%s2655_s4 + $0x460] sm:$0xff]  ;;  %v1494_v17 = vpack.c.bf16 %v456_v38, %v453_v11  ;;  %v820_v11 = vld [vmem:[%s2659_s7 + $0x108] sm:$0xff] }
 0x100   :  { %v1552_v13 = vpack.c.bf16 %v451_v10, %v448_v9  ;;  %v819_v9 = vld [vmem:[%s2659_s7 + $0x100] sm:$0xff] }
 0x101   :  { %v1590_v38 = vpack.c.bf16 %v820_v11, %v819_v9  ;;  %v1087_v60 = vld [vmem:[%s2663_s11 + $0x80] sm:$0xff]  ;;  %v1072_v9 = vld [vmem:[%s2663_s11 + $0x8] sm:$0xff]  ;;  %v1090_v11 = vld [vmem:[%s2663_s11 + $0x98] sm:$0xff] }
 0x102   :  { %1473 = vmatpush1.bf16.msra.mxu0 %v1472_v15  ;;  %1538 = vmatpush1.bf16.msra.mxu1 %v1537_v16  ;;  %v291_v16 = vrot.slane %v2197_v40, %v2336_v61  ;;  %v1555_v40 = vpack.c.bf16 %v457_v19, %v454_v32  ;;  %v822_v32 = vld [vmem:[%s2659_s7 + $0x118] sm:$0xff] }
 0x103   :  { %1475 = vmatprep.subr.bf16.mxu0 %v1474_v18  ;;  %1539 = vmatprep.subr.bf16.mxu1 %v1645_v34  ;;  %v455_v18 = vld [vmem:[%s2655_s4 + $0x498] sm:$0xff] }
 0x104   :  { %v1496_v20 = vpack.c.bf16 %v455_v18, %v452_v14 }
 0x106   :  { %1477 = vmatpush1.bf16.msra.mxu0 %v1476_v23  ;;  %1541 = vmatpush1.bf16.msra.mxu1 %v1540_v24  ;;  %v803_v23 = vld [vmem:[%s2659_s7 + $0x80] sm:$0xff]  ;;  %v804_v24 = vld [vmem:[%s2659_s7 + $0x88] sm:$0xff] }
 0x107   :  { %1479 = vmatprep.subr.bf16.mxu0 %v1478_v27  ;;  %1542 = vmatprep.subr.bf16.mxu1 %v1645_v34  ;;  %v1557_v26 = vpack.c.bf16 %v804_v24, %v803_v23  ;;  %v788_v27 = vld [vmem:[%s2659_s7 + $0x8] sm:$0xff] }
 0x108   :  { %v247_v50 = vpop.f32.mrb[2].mxu1  ;;  %v1559_v29 = vpack.c.bf16 %v788_v27, %v787_v25 }
 0x109   :  { %v249_v52 = vpop.f32.mrb[3].mxu1  ;;  %v276_v15 = vmul.f32 %v265_v6, %v247_v50  ;;  %v1569_v50 = vpack.c.bf16 %v810_v48, %v809_v47 }
 0x10a   :  { %1481 = vmatpush1.bf16.msra.mxu0 %v1480_v33  ;;  %1544 = vmatpush1.bf16.msra.mxu1 %v1543_v41  ;;  %v277_v56 = vmul.f32 %v269_v43, %v249_v52  ;;  %v790_v33 = vld [vmem:[%s2659_s7 + $0x18] sm:$0xff]  ;;  %v807_v41 = vld [vmem:[%s2659_s7 + $0xa0] sm:$0xff] }
 0x10b   :  { %1483 = vmatprep.subr.bf16.mxu0 %v1482_v44  ;;  %1545 = vmatprep.subr.bf16.mxu1 %v1645_v34  ;;  %v302_v21 = vadd.f32 %v291_v16, %v276_v15  ;;  %v1563_v43 = vpack.c.bf16 %v790_v33, %v789_v31  ;;  %v1565_v44 = vpack.c.bf16 %v808_v42, %v807_v41  ;;  %v794_v52 = vld [vmem:[%s2659_s7 + $0x38] sm:$0xff]  ;;  %v801_v15 = vld [vmem:[%s2659_s7 + $0x70] sm:$0xff] }
 0x10c   :  { %v303_v62 = vadd.f32 %v295_v51, %v277_v56  ;;  %v793_v51 = vld [vmem:[%s2659_s7 + $0x30] sm:$0xff]  ;;  %v802_v16 = vld [vmem:[%s2659_s7 + $0x78] sm:$0xff] }
 0x10d   :  { %v306_v22 = vmax.f32 %v302_v21, 0.0  ;;  %v1571_v55 = vpack.c.bf16 %v794_v52, %v793_v51  ;;  %v1587_v18 = vpack.c.bf16 %v802_v16, %v801_v15  ;;  %v975_v52 = vld [vmem:[%s2662_s9] sm:$0xff]  ;;  %v1073_v15 = vld [vmem:[%s2663_s11 + $0x10] sm:$0xff]  ;;  %v1074_v16 = vld [vmem:[%s2663_s11 + $0x18] sm:$0xff] }
 0x10e   :  { %1485 = vmatpush1.bf16.msra.mxu0 %v1484_v53  ;;  %1547 = vmatpush1.bf16.msra.mxu1 %v1546_v54  ;;  %v307_v5 = vmax.f32 %v303_v62, 0.0  ;;  %v811_v53 = vld [vmem:[%s2659_s7 + $0xc0] sm:$0xff]  ;;  %v812_v54 = vld [vmem:[%s2659_s7 + $0xc8] sm:$0xff] }
 0x10f   :  { %1487 = vmatprep.subr.bf16.mxu0 %v1486_v57  ;;  %1548 = vmatprep.subr.bf16.mxu1 %v1645_v34  ;;  %v1573_v56 = vpack.c.bf16 %v812_v54, %v811_v53  ;;  %v795_v57 = vld [vmem:[%s2659_s7 + $0x40] sm:$0xff]  ;;  %v977_v53 = vld [vmem:[%s2662_s9 + $0x10] sm:$0xff] }
 0x110   :  { %1219 = vmatprep.mubr.msk.f32.mxu0 %vm458_vm4, %v307_v5  ;;  %1220 = vmatprep.mubr.msk.f32.mxu1 %vm458_vm4, %v307_v5  ;;  %v1575_v62 = vpack.c.bf16 %v796_v58, %v795_v57  ;;  %v815_v5 = vld [vmem:[%s2659_s7 + $0xe0] sm:$0xff]  ;;  %v1597_v54 = vpack.c.bf16 %v977_v53, %v975_v52  ;;  %v981_v58 = vld [vmem:[%s2662_s9 + $0x30] sm:$0xff]  ;;  %v1102_v52 = vld [vmem:[%s2663_s11 + $0xf8] sm:$0xff] }
 0x111   :  { %v1581_v6 = vpack.c.bf16 %v816_v36, %v815_v5  ;;  %v979_v57 = vld [vmem:[%s2662_s9 + $0x20] sm:$0xff] }
 0x112   :  { %1489 = vmatpush1.bf16.msra.mxu0 %v1488_v2  ;;  %1550 = vmatpush1.bf16.msra.mxu1 %v1549_v4  ;;  %v798_v2 = vld [vmem:[%s2659_s7 + $0x58] sm:$0xff]  ;;  %v1601_v59 = vpack.c.bf16 %v981_v58, %v979_v57 }
 0x113   :  { %1491 = vmatprep.subr.bf16.mxu0 %v1490_v7  ;;  %1551 = vmatprep.subr.bf16.mxu1 %v1645_v34  ;;  %v1579_v4 = vpack.c.bf16 %v798_v2, %v797_v1  ;;  %v799_v7 = vld [vmem:[%s2659_s7 + $0x60] sm:$0xff] }
 0x114   :  { %v1583_v10 = vpack.c.bf16 %v800_v8, %v799_v7  ;;  %v1071_v8 = vld [vmem:[%s2663_s11] sm:$0xff] }
 0x116   :  { %1493 = vmatpush1.bf16.msra.mxu0 %v1492_v12  ;;  %1553 = vmatpush1.bf16.msra.mxu1 %v1552_v13  ;;  %v817_v12 = vld [vmem:[%s2659_s7 + $0xf0] sm:$0xff]  ;;  %v818_v13 = vld [vmem:[%s2659_s7 + $0xf8] sm:$0xff] }
 0x117   :  { %1495 = vmatprep.subr.bf16.mxu0 %v1494_v17  ;;  %1554 = vmatprep.subr.bf16.mxu1 %v1645_v34  ;;  %v1585_v14 = vpack.c.bf16 %v818_v13, %v817_v12  ;;  %v821_v17 = vld [vmem:[%s2659_s7 + $0x110] sm:$0xff]  ;;  %v1605_v12 = vpack.c.bf16 %v1072_v9, %v1071_v8 }
 0x118   :  { %v1593_v19 = vpack.c.bf16 %v822_v32, %v821_v17  ;;  %v1091_v17 = vld [vmem:[%s2663_s11 + $0xa0] sm:$0xff]  ;;  %v1609_v32 = vpack.c.bf16 %v1074_v16, %v1073_v15 }
 0x11a   :  { %1497 = vmatpush1.bf16.msra.mxu0 %v1496_v20  ;;  %1556 = vmatpush1.bf16.msra.mxu1 %v1555_v40 }
 0x11b   :  { %1589 = vmatprep.subr.bf16.mxu0 %v1645_v34  ;;  %1558 = vmatprep.subr.bf16.mxu1 %v1557_v26 }
 0x11d   :  { %598 = vmatmul.mubr.f32.vlgmr.msra.gmra.mrb[0].mxu0 %v306_v22  ;;  %739 = vmatmul.mubr.f32.vlgmr.msra.gmra.mrb[6].mxu1 %v306_v22  ;;  %v744_v22 = vld [vmem:[%s2660_s5] sm:$0x7] }
 0x11e   :  { %1560 = vmatpush3.bf16.msra.mxu1 %v1559_v29  ;;  %1591 = vmatpush3.bf16.msra.mxu0 %v1590_v38  ;;  %v749_v23 = vrot.slane %v744_v22, %v2184_v37  ;;  %v753_v24 = vrot.slane %v744_v22, %v2192_v39  ;;  %v757_v26 = vrot.slane %v744_v22, %v2336_v61  ;;  %v1094_v22 = vld [vmem:[%s2663_s11 + $0xb8] sm:$0xff] }
 0x11f   :  { %1562 = vmatprep.subr.bf16.mxu1 %v1561_v30  ;;  %1592 = vmatprep.subr.bf16.mxu0 %v1645_v34  ;;  %v764_v34 = vld [vmem:[%s2661_s6] sm:$0x7] }
 0x120   :  { %1343 = vmatprep.mubr.msk.f32.mxu0 %vm1646_vm5, %v1643_v3  ;;  %v769_v25 = vrot.slane %v764_v34, %v2184_v37  ;;  %v773_v28 = vrot.slane %v764_v34, %v2192_v39  ;;  %v777_v31 = vrot.slane %v764_v34, %v2336_v61  ;;  %v976_v61 = vld [vmem:[%s2662_s9 + $0x8] sm:$0xff] }
 0x122   :  { %1564 = vmatpush3.bf16.msra.mxu1 %v1563_v43  ;;  %1594 = vmatpush3.bf16.msra.mxu0 %v1593_v19 }
 0x123   :  { %1566 = vmatprep.subr.bf16.mxu1 %v1565_v44 }
 0x126   :  { %1568 = vmatpush3.bf16.msra.mxu1 %v1567_v49 }
 0x127   :  { %1570 = vmatprep.subr.bf16.mxu1 %v1569_v50  ;;  %v978_v50 = vld [vmem:[%s2662_s9 + $0x18] sm:$0xff] }
 0x128   :  { %v1595_v51 = vpack.c.bf16 %v978_v50, %v976_v61  ;;  %v1084_v61 = vld [vmem:[%s2663_s11 + $0x68] sm:$0xff] }
 0x12a   :  { %1572 = vmatpush3.bf16.msra.mxu1 %v1571_v55  ;;  %1596 = vmatprep.subr.bf16.mxu0 %v1595_v51  ;;  %v982_v55 = vld [vmem:[%s2662_s9 + $0x38] sm:$0xff]  ;;  %v1101_v51 = vld [vmem:[%s2663_s11 + $0xf0] sm:$0xff] }
 0x12b   :  { %1574 = vmatprep.subr.bf16.mxu1 %v1573_v56  ;;  %v1631_v53 = vpack.c.bf16 %v1102_v52, %v1101_v51 }
 0x12e   :  { %1576 = vmatpush3.bf16.msra.mxu1 %v1575_v62  ;;  %v1088_v62 = vld [vmem:[%s2663_s11 + $0x88] sm:$0xff] }
 0x12f   :  { %1578 = vmatprep.subr.bf16.mxu1 %v1577_v63  ;;  %v1603_v63 = vpack.c.bf16 %v1088_v62, %v1087_v60 }
 0x132   :  { %1580 = vmatpush3.bf16.msra.mxu1 %v1579_v4  ;;  %v1221_v4 = vld [vmem:[%s2664_s8] ss:$0 sm:$0xff] }
 0x133   :  { %1582 = vmatprep.subr.bf16.mxu1 %v1581_v6 }
 0x136   :  { %1584 = vmatpush3.bf16.msra.mxu1 %v1583_v10  ;;  %v1089_v10 = vld [vmem:[%s2663_s11 + $0x90] sm:$0xff] }
 0x137   :  { %1586 = vmatprep.subr.bf16.mxu1 %v1585_v14  ;;  %v1607_v14 = vpack.c.bf16 %v1090_v11, %v1089_v10 }
 0x13a   :  { %1588 = vmatpush3.bf16.msra.mxu1 %v1587_v18  ;;  %v1092_v18 = vld [vmem:[%s2663_s11 + $0xa8] sm:$0xff] }
 0x13b   :  { %v1611_v19 = vpack.c.bf16 %v1092_v18, %v1091_v17 }
 0x1cc   :  { %v1257_v20 = vpop.f32.mrb[4].mxu1 }
 0x1cd   :  { %v1258_v40 = vpop.f32.mrb[5].mxu1 }
 0x1ce   :  { %v1259_v21 = vadd.f32 %v1258_v40, %v1257_v20  ;;  %v1075_v20 = vld [vmem:[%s2663_s11 + $0x20] sm:$0xff]  ;;  %v1076_v40 = vld [vmem:[%s2663_s11 + $0x28] sm:$0xff] }
 0x1cf   :  { %v1613_v34 = vpack.c.bf16 %v1076_v40, %v1075_v20 }
 0x1f0   :  { %v599_v27 = vpop.f32.mrb[0].mxu0  ;;  %v740_v0 = vpop.f32.mrb[6].mxu1 }
 0x1f1   :  { %v761_v29 = vmul.f32 %v749_v23, %v599_v27  ;;  %v741_v30 = vadd.f32 %v1259_v21, %v740_v0  ;;  %v601_v33 = vpop.f32.mrb[1].mxu0  ;;  %v742_v41 = vpop.f32.mrb[7].mxu1  ;;  %v1093_v21 = vld [vmem:[%s2663_s11 + $0xb0] sm:$0xff]  ;;  %v1096_v27 = vld [vmem:[%s2663_s11 + $0xc8] sm:$0xff] }
 0x1f2   :  { %v762_v42 = vmul.f32 %v753_v24, %v601_v33  ;;  %v1615_v23 = vpack.c.bf16 %v1094_v22, %v1093_v21  ;;  %v1077_v24 = vld [vmem:[%s2663_s11 + $0x30] sm:$0xff]  ;;  %v1098_v33 = vld [vmem:[%s2663_s11 + $0xd8] sm:$0xff] }
 0x1f3   :  { %v781_v43 = vadd.f32 %v769_v25, %v761_v29  ;;  %v763_v44 = vmul.f32 %v757_v26, %v741_v30  ;;  %v1078_v25 = vld [vmem:[%s2663_s11 + $0x38] sm:$0xff]  ;;  %v1095_v26 = vld [vmem:[%s2663_s11 + $0xc0] sm:$0xff]  ;;  %v1080_v30 = vld [vmem:[%s2663_s11 + $0x48] sm:$0xff] }
 0x1f4   :  { %v782_v45 = vadd.f32 %v773_v28, %v762_v42  ;;  %v1617_v0 = vpack.c.bf16 %v1078_v25, %v1077_v24  ;;  %v1619_v28 = vpack.c.bf16 %v1096_v27, %v1095_v26  ;;  %v1079_v29 = vld [vmem:[%s2663_s11 + $0x40] sm:$0xff] }
 0x1f5   :  { %v783_v46 = vadd.f32 %v777_v31, %v763_v44  ;;  %v784_v48 = vmax.f32 %v781_v43, 0.0  ;;  %v1097_v31 = vld [vmem:[%s2663_s11 + $0xd0] sm:$0xff]  ;;  %v1621_v41 = vpack.c.bf16 %v1080_v30, %v1079_v29  ;;  %v1082_v44 = vld [vmem:[%s2663_s11 + $0x58] sm:$0xff] }
 0x1f6   :  { %v785_v47 = vmax.f32 %v782_v45, 0.0  ;;  %v1623_v42 = vpack.c.bf16 %v1098_v33, %v1097_v31  ;;  %v1081_v43 = vld [vmem:[%s2663_s11 + $0x50] sm:$0xff]  ;;  %v1099_v45 = vld [vmem:[%s2663_s11 + $0xe0] sm:$0xff] }
 0x1f7   :  { %v786_v49 = vmax.f32 %v783_v46, 0.0  ;;  %v1100_v46 = vld [vmem:[%s2663_s11 + $0xe8] sm:$0xff] }
 0x1f8   :  { %898 = vmatprep.mubr.f32.mxu1 %v785_v47  ;;  %v1625_v47 = vpack.c.bf16 %v1082_v44, %v1081_v43 }
 0x1f9   :  { %899 = vmatmul.mubr.f32.vlgmr.msra.gmra.mrb[8].mxu1 %v784_v48  ;;  %1344 = vmatmul.mubr.msk.f32.vlgmr.msra.gmra.mrb[2].mxu0 %vm830_vm6, %v786_v49  ;;  %v1627_v48 = vpack.c.bf16 %v1100_v46, %v1099_v45  ;;  %v1083_v49 = vld [vmem:[%s2663_s11 + $0x60] sm:$0xff] }
 0x1fa   :  { %1062 = vmatprep.mubr.f32.mxu0 %v1643_v3  ;;  %1598 = vmatpush1.bf16.msra.mxu0 %v1597_v54  ;;  %v980_v3 = vld [vmem:[%s2662_s9 + $0x28] sm:$0xff]  ;;  %v1629_v50 = vpack.c.bf16 %v1084_v61, %v1083_v49  ;;  %v1085_v54 = vld [vmem:[%s2663_s11 + $0x70] sm:$0xff] }
 0x1fb   :  { %v1599_v56 = vpack.c.bf16 %v982_v55, %v980_v3  ;;  %v1086_v3 = vld [vmem:[%s2663_s11 + $0x78] sm:$0xff] }
 0x1fc   :  { %v1633_v55 = vpack.c.bf16 %v1086_v3, %v1085_v54 }
 0x1fd   :  { %1600 = vmatprep.subr.bf16.mxu0 %v1599_v56  ;;  %v983_v56 = vld [vmem:[%s2665_s10] sm:$0x3] }
 0x1fe   :  { %1602 = vmatpush1.bf16.msra.mxu0 %v1601_v59  ;;  %v988_v57 = vrot.slane %v983_v56, %v2184_v37  ;;  %v992_v58 = vrot.slane %v983_v56, %v2192_v39 }
 0x1ff   :  { %1604 = vmatprep.subr.bf16.mxu0 %v1603_v63 }
 0x2cc   :  { %v1292_v1 = vpop.f32.mrb[8].mxu1  ;;  %v970_v2 = vpop.f32.mrb[2].mxu0 }
 0x2cd   :  { %v1293_v5 = vpop.f32.mrb[9].mxu1  ;;  %v1345_v36 = vpop.f32.mrb[3].mxu0 }
 0x2ce   :  { %v1294_v6 = vadd.f32 %v1293_v5, %v1292_v1  ;;  %v1224_v36 = vld [vmem:[%s2666_s12] ss:$0 sm:$0xff] }
 0x2d0   :  { %v901_v7 = vadd.f32 %v1294_v6, %v1221_v4  ;;  %v1181_v4 = vand.u32 127, %v254_v35 }
 0x2d2   :  { %v971_v38 = vadd.f32 %v970_v2, %v901_v7  ;;  %vm1182_vm7 = vcmp.ge.s32.totalorder %v1181_v4, 1  ;;  %vm1183_vm8 = vcmp.lt.s32.totalorder %v1181_v4, 4  ;;  %vm1199_vm10 = vcmp.eq.s32.totalorder %v1181_v4, 0 }
 0x2d3   :  { %vm2641_vm9 = vmand %vm1182_vm7, %vm1183_vm8 }
 0x2d4   :  { %v974_v13 = vmax.f32 %v971_v38, 0.0 }
 0x2d6   :  { %1223 = vmatmul.mubr.msk.f32.vlgmr.msra.gmra.mrb[4].mxu0 %vm830_vm6, %v974_v13 }
 0x2d7   :  { %1606 = vmatpush3.bf16.msra.mxu0 %v1605_v12 }
 0x2d8   :  { %1608 = vmatprep.subr.bf16.mxu0 %v1607_v14 }
 0x2db   :  { %1610 = vmatpush3.bf16.msra.mxu0 %v1609_v32 }
 0x2dc   :  { %1612 = vmatprep.subr.bf16.mxu0 %v1611_v19 }
 0x2df   :  { %1614 = vmatpush3.bf16.msra.mxu0 %v1613_v34 }
 0x2e0   :  { %1616 = vmatprep.subr.bf16.mxu0 %v1615_v23 }
 0x2e3   :  { %1618 = vmatpush3.bf16.msra.mxu0 %v1617_v0 }
 0x2e4   :  { %1620 = vmatprep.subr.bf16.mxu0 %v1619_v28 }
 0x2e7   :  { %1622 = vmatpush3.bf16.msra.mxu0 %v1621_v41 }
 0x2e8   :  { %1624 = vmatprep.subr.bf16.mxu0 %v1623_v42 }
 0x2eb   :  { %1626 = vmatpush3.bf16.msra.mxu0 %v1625_v47 }
 0x2ec   :  { %1628 = vmatprep.subr.bf16.mxu0 %v1627_v48 }
 0x2ef   :  { %1630 = vmatpush3.bf16.msra.mxu0 %v1629_v50 }
 0x2f0   :  { %1632 = vmatprep.subr.bf16.mxu0 %v1631_v53 }
 0x2f3   :  { %1634 = vmatpush3.bf16.msra.mxu0 %v1633_v55 }
 0x3a9   :  { %v1064_v59 = vpop.f32.mrb[4].mxu0 }
 0x3aa   :  { %v1065_v60 = vadd.f32 %v1064_v59, %v988_v57  ;;  %v1066_v62 = vpop.f32.mrb[5].mxu0 }
 0x3ab   :  { %v1067_v63 = vadd.f32 %v1066_v62, %v992_v58 }
 0x3ac   :  { %v1069_v2 = vmax.f32 %v1065_v60, 0.0 }
 0x3ad   :  { %v1070_v1 = vmax.f32 %v1067_v63, 0.0 }
 0x3af   :  { %1174 = vmatprep.mubr.f32.mxu0 %v1070_v1 }
 0x3b0   :  { %1175 = vmatmul.mubr.f32.vlgmr.msra.gmra.mrb[6].mxu0 %v1069_v2 }
 0x483   :  { %v1332_v5 = vpop.f32.mrb[6].mxu0 }
 0x484   :  { %v1333_v37 = vpop.f32.mrb[7].mxu0 }
 0x485   :  { %v1334_v6 = vadd.f32 %v1333_v37, %v1332_v5 }
 0x487   :  { %v1177_v7 = vadd.f32 %v1334_v6, %v1224_v36 }
 0x489   :  { %v1185_v8 = vsel %vm2641_vm9, %v1177_v7, 0.0  ;;  %v1200_v9 = vsel %vm1199_vm10, %v1177_v7, 0.0 }
 0x48a   :  { %v1186_v35 = vsel %vm97_vm0, %v1185_v8, 0.0  ;;  %v1201_v10 = vsel %vm97_vm0, %v1200_v9, 0.0 }
 0x48b   :  { %1187 = vadd.xlane.f32.xlu0 %v1186_v35 }
 0x48f   :  { %1202 = vadd.xlane.f32.xlu0 %v1201_v10 }
 0x518   :  { %v1188_v11 = vpop.xlane.xlu0 %1187 }
 0x519   :  { %v1189_v38 = vrot.slane %v1188_v11, 4 }
 0x51b   :  { %v1190_v12 = vadd.f32 %v1189_v38, %v1188_v11 }
 0x51c   :  { %v1203_v17 = vpop.xlane.xlu0 %1202 }
 0x51d   :  { %v1191_v13 = vrot.slane %v1190_v12, 2  ;;  %v1204_v18 = vadd.f32 %v1203_v17, %v1177_v7 }
 0x51f   :  { %v1192_v14 = vadd.f32 %v1191_v13, %v1190_v12 }
 0x521   :  { %v1193_v15 = vrot.slane %v1192_v14, 1 }
 0x523   :  { %v1194_v16 = vadd.f32 %v1193_v15, %v1192_v14 }
 0x525   :  { %1637 = vpush %v1194_v16 }
 0x556   :  { %s1638_s10 = spop %1637 }
 0x557   :  { %s1198_s12 = smul.f32 0.16666667, %s1638_s10 }
 0x559   :  { %v1205_v32 = vstv %s1198_s12 }
 0x55a   :  { %v1206_v19 = vsub.f32 %v1204_v18, %v1205_v32 }
 0x55c   :  { %v1207_v20 = vsel %vm2641_vm9, %v1206_v19, 0.0 }
 0x55d   :  { %1208 = vst [vmem:[%s2667_s13] sm:$0x3] %v1207_v20 }

</bundles_post_ra>
